<compile_context>
chip_gen: v7x
topology: tpu7x:2x2x1
jax: 0.10.0
libtpu: 0.0.40
codegen_flags: <defaults>
</compile_context>

<pallas_src>
import jax
import jax.numpy as jnp
from jax.experimental import pallas as pl
from jax.experimental.pallas import tpu as pltpu

LN_EPS = 1e-5
LANE = 128
SUBLANE = 8


def _round_up(x, m):
    return (x + m - 1) // m * m


def _pad2d(a, rows, cols):
    r, c = a.shape
    return jnp.pad(a, ((0, rows - r), (0, cols - c)))


# ----------------------------------------------------------------------------
# Kernel
# ----------------------------------------------------------------------------
def _make_actor_kernel(hidden_dim, hid_pad, act_pad, compute_dtype):
    inv_h = 1.0 / float(hidden_dim)

    def _ln(h, gamma, beta):
        # One-pass LayerNorm stats over the *real* hidden features, always in
        # f32 (h is the f32 matmul accumulator).  Padded lanes of h are exact
        # zeros so sum / sum-of-squares are unaffected; dividing by hidden_dim
        # (not hid_pad) gives torch-exact mean/var.  Padded lanes of gamma and
        # beta are zero, so padded output lanes stay exactly zero.
        s1 = jnp.sum(h, axis=-1, keepdims=True)
        s2 = jnp.sum(h * h, axis=-1, keepdims=True)
        mean = s1 * inv_h
        var = s2 * inv_h - mean * mean
        return (h - mean) * jax.lax.rsqrt(var + LN_EPS) * gamma + beta

    def kernel(x_ref, w1_ref, w2_ref, wmu_ref, vec_ref, out_ref):
        x = x_ref[...]  # already in compute_dtype (f32 or bf16)

        # Packed per-feature params (always f32): rows b1,g1,bt1,b2,g2,bt2,bmu.
        b1 = vec_ref[0:1, :hid_pad]
        g1 = vec_ref[1:2, :hid_pad]
        bt1 = vec_ref[2:3, :hid_pad]
        b2 = vec_ref[3:4, :hid_pad]
        g2 = vec_ref[4:5, :hid_pad]
        bt2 = vec_ref[5:6, :hid_pad]
        bmu = vec_ref[6:7, :act_pad]

        # linear1 -> ln1 -> relu1   (MXU in compute_dtype, f32 accumulation;
        # all vector/EUP math stays f32 -> valid on v5e too.)
        h = jnp.dot(x, w1_ref[...], preferred_element_type=jnp.float32) + b1
        h = jnp.maximum(_ln(h, g1, bt1), 0.0)

        # linear2 -> ln2 -> relu2
        h = jnp.dot(h.astype(compute_dtype), w2_ref[...],
                    preferred_element_type=jnp.float32) + b2
        h = jnp.maximum(_ln(h, g2, bt2), 0.0)

        # mu -> tanh
        h = jnp.dot(h.astype(compute_dtype), wmu_ref[...],
                    preferred_element_type=jnp.float32) + bmu
        out_ref[...] = jnp.tanh(h).astype(out_ref.dtype)

    return kernel


# ----------------------------------------------------------------------------
# Wrapper
# ----------------------------------------------------------------------------
def prepare_actor_params(params, compute_dtype=jnp.float32):
    """Pad weights once (sublane-aligned K, lane-dense N) and pack the per-feature vectors."""
    in_dim, hidden = params["w1"].shape
    action = params["wmu"].shape[1]
    in_pad = _round_up(in_dim, SUBLANE)   # NOT lane-padded: cuts x DMA bytes
    hid_pad = _round_up(hidden, LANE)     # lane-dense hidden / output dims
    act_pad = _round_up(action, LANE)
    vec_w = max(hid_pad, act_pad)

    w1 = _pad2d(params["w1"].astype(compute_dtype), in_pad, hid_pad)
    w2 = _pad2d(params["w2"].astype(compute_dtype), hid_pad, hid_pad)
    wmu = _pad2d(params["wmu"].astype(compute_dtype), hid_pad, act_pad)

    def row(v):
        return _pad2d(v.reshape(1, -1).astype(jnp.float32), 1, vec_w)

    vec = jnp.concatenate(
        [
            row(params["b1"]),
            row(params["g1"]),
            row(params["bt1"]),
            row(params["b2"]),
            row(params["g2"]),
            row(params["bt2"]),
            row(params["bmu"]),
            jnp.zeros((1, vec_w), jnp.float32),
        ],
        axis=0,
    )  # (8, vec_w): one sublane-aligned operand instead of 7 tiny DMAs

    return {
        "w1": w1,
        "w2": w2,
        "wmu": wmu,
        "vec": vec,
        "dims": (in_dim, hidden, action, in_pad, hid_pad, act_pad),
    }


def actor_forward(x, prepared, *, max_batch_tile=2048):
    """Full Actor MLP in one Pallas kernel, tiled over batch."""
    in_dim, hidden, action, in_pad, hid_pad, act_pad = prepared["dims"]
    compute_dtype = prepared["w1"].dtype
    itemsize = jnp.dtype(compute_dtype).itemsize
    batch = x.shape[0]
    vec_w = prepared["vec"].shape[1]

    # Pad batch only to a sublane multiple; the grid uses cdiv so the partial
    # last block (if any) is masked instead of padding up to a tile boundary.
    b_pad = _round_up(batch, SUBLANE)
    tm = min(_round_up(max_batch_tile, SUBLANE), b_pad)

    # VMEM budget: double-buffered x/out tiles + single-buffered resident
    # weights + f32 intermediates must fit comfortably under v7x's 64 MiB.
    def vmem_bytes(t):
        return (
            2 * t * (in_pad + act_pad) * itemsize                               # x/out, 2 bufs
            + (in_pad * hid_pad + hid_pad * hid_pad + hid_pad * act_pad) * itemsize  # weights
            + 8 * vec_w * 4                                                     # packed params
            + 4 * t * hid_pad * 4                                               # f32 intermediates
        )

    budget = 48 << 20
    while tm > SUBLANE and vmem_bytes(tm) > budget:
        tm = _round_up(tm // 2, SUBLANE)
    vmem_limit = int(min(max(2 * vmem_bytes(tm), 24 << 20), 48 << 20))

    num_steps = pl.cdiv(b_pad, tm)

    xp = _pad2d(x.astype(compute_dtype), b_pad, in_pad)

    kernel = _make_actor_kernel(hidden, hid_pad, act_pad, compute_dtype)

    flops = int(2 * b_pad * (in_pad * hid_pad + hid_pad * hid_pad + hid_pad * act_pad))
    transcendentals = int(b_pad * (act_pad + 2))
    bytes_accessed = int(
        xp.size * itemsize
        + (prepared["w1"].size + prepared["w2"].size + prepared["wmu"].size) * itemsize
        + prepared["vec"].size * 4
        + b_pad * act_pad * itemsize
    )

    # TODO(synk): on v7x, verify "parallel" shards the batch grid across both
    # TensorCores; switch to pltpu.CORE_PARALLEL if profiling shows it doesn't.
    out = pl.pallas_call(
        kernel,
        out_shape=jax.ShapeDtypeStruct((b_pad, act_pad), compute_dtype),
        grid=(num_steps,),
        in_specs=[
            # x: batch-tiled, double-buffered by the Pallas pipeline.
            pl.BlockSpec((tm, in_pad), lambda i: (i, 0)),
            # Weights + packed params: constant index_map -> resident in VMEM;
            # Buffered(1) avoids allocating an unused second buffer.
            pl.BlockSpec((in_pad, hid_pad), lambda i: (0, 0),
                         pipeline_mode=pl.Buffered(1)),
            pl.BlockSpec((hid_pad, hid_pad), lambda i: (0, 0),
                         pipeline_mode=pl.Buffered(1)),
            pl.BlockSpec((hid_pad, act_pad), lambda i: (0, 0),
                         pipeline_mode=pl.Buffered(1)),
            pl.BlockSpec((8, vec_w), lambda i: (0, 0),
                         pipeline_mode=pl.Buffered(1)),
        ],
        out_specs=pl.BlockSpec((tm, act_pad), lambda i: (i, 0)),
        compiler_params=pltpu.CompilerParams(
            dimension_semantics=("parallel",),
            vmem_limit_bytes=vmem_limit,
        ),
        cost_estimate=pl.CostEstimate(
            flops=flops,
            transcendentals=transcendentals,
            bytes_accessed=bytes_accessed,
        ),
    )(xp, prepared["w1"], prepared["w2"], prepared["wmu"], prepared["vec"])

    return out[:batch, :action]


# ----------------------------------------------------------------------------
# Params / reference
# ----------------------------------------------------------------------------
def init_actor_params(key, input_dim, action_dim, hidden_dim=128):
    """Synthetic init matching the torch module's shapes (weights stored [in, out])."""
    k1, k2, k3, k4, k5, k6 = jax.random.split(key, 6)

    def lin(kw, kb, fan_in, fan_out):
        bound = 1.0 / jnp.sqrt(fan_in)
        w = jax.random.uniform(kw, (fan_in, fan_out), jnp.float32, -bound, bound)
        b = jax.random.uniform(kb, (1, fan_out), jnp.float32, -bound, bound)
        return w, b

    w1, b1 = lin(k1, k2, input_dim, hidden_dim)
    w2, b2 = lin(k3, k4, hidden_dim, hidden_dim)
    wmu, bmu = lin(k5, k6, hidden_dim, action_dim)

    return {
        "w1": w1, "b1": b1,
        "g1": jnp.ones((1, hidden_dim), jnp.float32),
        "bt1": jnp.zeros((1, hidden_dim), jnp.float32),
        "w2": w2, "b2": b2,
        "g2": jnp.ones((1, hidden_dim), jnp.float32),
        "bt2": jnp.zeros((1, hidden_dim), jnp.float32),
        "wmu": wmu, "bmu": bmu,
    }


def actor_reference(x, p):
    """Pure-JAX reference (two-pass LayerNorm, torch semantics)."""
    def ln(h, g, b):
        m = jnp.mean(h, axis=-1, keepdims=True)
        v = jnp.mean((h - m) ** 2, axis=-1, keepdims=True)
        return (h - m) * jax.lax.rsqrt(v + LN_EPS) * g + b

    h = jnp.maximum(ln(x @ p["w1"] + p["b1"], p["g1"], p["bt1"]), 0.0)
    h = jnp.maximum(ln(h @ p["w2"] + p["b2"], p["g2"], p["bt2"]), 0.0)
    return jnp.tanh(h @ p["wmu"] + p["bmu"])


if __name__ == "__main__":
    key = jax.random.PRNGKey(0)
    k_params, k_x = jax.random.split(key)

    batch, input_dim, action_dim, hidden_dim = 8, 16, 4, 32

    params = init_actor_params(k_params, input_dim, action_dim, hidden_dim)
    x = jax.random.normal(k_x, (batch, input_dim), jnp.float32)
    ref = actor_reference(x, params)

    # f32 path: exact (1e-5) match against the pure-JAX reference.
    prepared_f32 = prepare_actor_params(params, compute_dtype=jnp.float32)
    mu32 = actor_forward(x, prepared_f32)
    jax.block_until_ready(mu32)
    assert mu32.shape == (batch, action_dim)
    assert jnp.allclose(mu32, ref, atol=1e-5, rtol=1e-5), "f32 mismatch vs reference"

    # bf16 operand path (v6e/v7x perf mode): bf16 MXU operands, f32 accumulation
    # and f32 LayerNorm/ReLU/tanh; validated with a loosened tolerance.
    prepared_bf16 = prepare_actor_params(params, compute_dtype=jnp.bfloat16)
    mu16 = actor_forward(x, prepared_bf16)
    jax.block_until_ready(mu16)
    assert mu16.shape == (batch, action_dim)
    assert jnp.allclose(mu16.astype(jnp.float32), ref, atol=5e-2, rtol=5e-2), \
        "bf16 mismatch vs reference"

    print("KERNEL_OK")
</pallas_src>

<mosaic_0001>
module attributes {stable_mosaic.version = 11 : i64} {
  func.func @kernel(%arg0: i32, %arg1: memref<8x16xf32, #tpu.memory_space<vmem>>, %arg2: memref<16x128xf32, #tpu.memory_space<vmem>>, %arg3: memref<128x128xf32, #tpu.memory_space<vmem>>, %arg4: memref<128x128xf32, #tpu.memory_space<vmem>>, %arg5: memref<8x128xf32, #tpu.memory_space<vmem>>, %arg6: memref<8x128xf32, #tpu.memory_space<vmem>>) attributes {dimension_semantics = [#tpu.dimension_semantics<parallel>], iteration_bounds = array<i64: 1>, scalar_prefetch = 0 : i64, scratch_operands = 0 : i64, tpu.core_type = #tpu.core_type<tc>, window_params = [{transform_indices = @transform_0, window_bounds = array<i64: 8, 16>}, {pipeline_mode = #tpu.pipeline_mode<synchronous>, transform_indices = @transform_1, window_bounds = array<i64: 16, 128>}, {pipeline_mode = #tpu.pipeline_mode<synchronous>, transform_indices = @transform_2, window_bounds = array<i64: 128, 128>}, {pipeline_mode = #tpu.pipeline_mode<synchronous>, transform_indices = @transform_3, window_bounds = array<i64: 128, 128>}, {pipeline_mode = #tpu.pipeline_mode<synchronous>, transform_indices = @transform_4, window_bounds = array<i64: 8, 128>}, {transform_indices = @transform_5, window_bounds = array<i64: 8, 128>}]} {
    %c0 = arith.constant 0 : index
    %c0_0 = arith.constant 0 : index
    %0 = vector.load %arg1[%c0, %c0_0] : memref<8x16xf32, #tpu.memory_space<vmem>>, vector<8x16xf32>
    %c0_1 = arith.constant 0 : index
    %c0_2 = arith.constant 0 : index
    %1 = vector.load %arg5[%c0_1, %c0_2] : memref<8x128xf32, #tpu.memory_space<vmem>>, vector<1x128xf32>
    %c1 = arith.constant 1 : index
    %c0_3 = arith.constant 0 : index
    %2 = vector.load %arg5[%c1, %c0_3] : memref<8x128xf32, #tpu.memory_space<vmem>>, vector<1x128xf32>
    %c2 = arith.constant 2 : index
    %c0_4 = arith.constant 0 : index
    %3 = vector.load %arg5[%c2, %c0_4] : memref<8x128xf32, #tpu.memory_space<vmem>>, vector<1x128xf32>
    %c3 = arith.constant 3 : index
    %c0_5 = arith.constant 0 : index
    %4 = vector.load %arg5[%c3, %c0_5] : memref<8x128xf32, #tpu.memory_space<vmem>>, vector<1x128xf32>
    %c4 = arith.constant 4 : index
    %c0_6 = arith.constant 0 : index
    %5 = vector.load %arg5[%c4, %c0_6] : memref<8x128xf32, #tpu.memory_space<vmem>>, vector<1x128xf32>
    %c5 = arith.constant 5 : index
    %c0_7 = arith.constant 0 : index
    %6 = vector.load %arg5[%c5, %c0_7] : memref<8x128xf32, #tpu.memory_space<vmem>>, vector<1x128xf32>
    %c6 = arith.constant 6 : index
    %c0_8 = arith.constant 0 : index
    %7 = vector.load %arg5[%c6, %c0_8] : memref<8x128xf32, #tpu.memory_space<vmem>>, vector<1x128xf32>
    %c0_9 = arith.constant 0 : index
    %c0_10 = arith.constant 0 : index
    %8 = vector.load %arg2[%c0_9, %c0_10] : memref<16x128xf32, #tpu.memory_space<vmem>>, vector<16x128xf32>
    %cst = arith.constant dense<0.000000e+00> : vector<8x128xf32>
    %9 = tpu.matmul %0, %8, %cst {dimension_numbers = #tpu.dot_dimension_numbers<[1], [0], [0], [1], [0, 0, 1, 1], [], []>} : vector<8x16xf32>, vector<16x128xf32>, vector<8x128xf32> -> vector<8x128xf32>
    %10 = vector.broadcast %1 : vector<1x128xf32> to vector<8x128xf32>
    %11 = arith.addf %9, %10 : vector<8x128xf32>
    %cst_11 = arith.constant dense<0.000000e+00> : vector<8xf32>
    %12 = vector.multi_reduction <add>, %11, %cst_11 [1] : vector<8x128xf32> to vector<8xf32>
    %13 = vector.shape_cast %12 : vector<8xf32> to vector<8x1xf32>
    %14 = arith.mulf %11, %11 : vector<8x128xf32>
    %cst_12 = arith.constant dense<0.000000e+00> : vector<8xf32>
    %15 = vector.multi_reduction <add>, %14, %cst_12 [1] : vector<8x128xf32> to vector<8xf32>
    %16 = vector.shape_cast %15 : vector<8xf32> to vector<8x1xf32>
    %cst_13 = arith.constant 3.125000e-02 : f32
    %17 = vector.broadcast %cst_13 : f32 to vector<8x1xf32>
    %18 = arith.mulf %13, %17 : vector<8x1xf32>
    %cst_14 = arith.constant 3.125000e-02 : f32
    %19 = vector.broadcast %cst_14 : f32 to vector<8x1xf32>
    %20 = arith.mulf %16, %19 : vector<8x1xf32>
    %21 = arith.mulf %18, %18 : vector<8x1xf32>
    %22 = arith.subf %20, %21 : vector<8x1xf32>
    %23 = vector.broadcast %18 : vector<8x1xf32> to vector<8x128xf32>
    %24 = arith.subf %11, %23 : vector<8x128xf32>
    %cst_15 = arith.constant 9.99999974E-6 : f32
    %25 = vector.broadcast %cst_15 : f32 to vector<8x1xf32>
    %26 = arith.addf %22, %25 : vector<8x1xf32>
    %27 = math.rsqrt %26 : vector<8x1xf32>
    %28 = vector.broadcast %27 : vector<8x1xf32> to vector<8x128xf32>
    %29 = arith.mulf %24, %28 : vector<8x128xf32>
    %30 = vector.broadcast %2 : vector<1x128xf32> to vector<8x128xf32>
    %31 = arith.mulf %29, %30 : vector<8x128xf32>
    %32 = vector.broadcast %3 : vector<1x128xf32> to vector<8x128xf32>
    %33 = arith.addf %31, %32 : vector<8x128xf32>
    %cst_16 = arith.constant 0.000000e+00 : f32
    %34 = vector.broadcast %cst_16 : f32 to vector<8x128xf32>
    %35 = arith.maximumf %33, %34 : vector<8x128xf32>
    %c0_17 = arith.constant 0 : index
    %c0_18 = arith.constant 0 : index
    %36 = vector.load %arg3[%c0_17, %c0_18] : memref<128x128xf32, #tpu.memory_space<vmem>>, vector<128x128xf32>
    %cst_19 = arith.constant dense<0.000000e+00> : vector<8x128xf32>
    %37 = tpu.matmul %35, %36, %cst_19 {dimension_numbers = #tpu.dot_dimension_numbers<[1], [0], [0], [1], [0, 0, 1, 1], [], []>} : vector<8x128xf32>, vector<128x128xf32>, vector<8x128xf32> -> vector<8x128xf32>
    %38 = vector.broadcast %4 : vector<1x128xf32> to vector<8x128xf32>
    %39 = arith.addf %37, %38 : vector<8x128xf32>
    %cst_20 = arith.constant dense<0.000000e+00> : vector<8xf32>
    %40 = vector.multi_reduction <add>, %39, %cst_20 [1] : vector<8x128xf32> to vector<8xf32>
    %41 = vector.shape_cast %40 : vector<8xf32> to vector<8x1xf32>
    %42 = arith.mulf %39, %39 : vector<8x128xf32>
    %cst_21 = arith.constant dense<0.000000e+00> : vector<8xf32>
    %43 = vector.multi_reduction <add>, %42, %cst_21 [1] : vector<8x128xf32> to vector<8xf32>
    %44 = vector.shape_cast %43 : vector<8xf32> to vector<8x1xf32>
    %cst_22 = arith.constant 3.125000e-02 : f32
    %45 = vector.broadcast %cst_22 : f32 to vector<8x1xf32>
    %46 = arith.mulf %41, %45 : vector<8x1xf32>
    %cst_23 = arith.constant 3.125000e-02 : f32
    %47 = vector.broadcast %cst_23 : f32 to vector<8x1xf32>
    %48 = arith.mulf %44, %47 : vector<8x1xf32>
    %49 = arith.mulf %46, %46 : vector<8x1xf32>
    %50 = arith.subf %48, %49 : vector<8x1xf32>
    %51 = vector.broadcast %46 : vector<8x1xf32> to vector<8x128xf32>
    %52 = arith.subf %39, %51 : vector<8x128xf32>
    %cst_24 = arith.constant 9.99999974E-6 : f32
    %53 = vector.broadcast %cst_24 : f32 to vector<8x1xf32>
    %54 = arith.addf %50, %53 : vector<8x1xf32>
    %55 = math.rsqrt %54 : vector<8x1xf32>
    %56 = vector.broadcast %55 : vector<8x1xf32> to vector<8x128xf32>
    %57 = arith.mulf %52, %56 : vector<8x128xf32>
    %58 = vector.broadcast %5 : vector<1x128xf32> to vector<8x128xf32>
    %59 = arith.mulf %57, %58 : vector<8x128xf32>
    %60 = vector.broadcast %6 : vector<1x128xf32> to vector<8x128xf32>
    %61 = arith.addf %59, %60 : vector<8x128xf32>
    %cst_25 = arith.constant 0.000000e+00 : f32
    %62 = vector.broadcast %cst_25 : f32 to vector<8x128xf32>
    %63 = arith.maximumf %61, %62 : vector<8x128xf32>
    %c0_26 = arith.constant 0 : index
    %c0_27 = arith.constant 0 : index
    %64 = vector.load %arg4[%c0_26, %c0_27] : memref<128x128xf32, #tpu.memory_space<vmem>>, vector<128x128xf32>
    %cst_28 = arith.constant dense<0.000000e+00> : vector<8x128xf32>
    %65 = tpu.matmul %63, %64, %cst_28 {dimension_numbers = #tpu.dot_dimension_numbers<[1], [0], [0], [1], [0, 0, 1, 1], [], []>} : vector<8x128xf32>, vector<128x128xf32>, vector<8x128xf32> -> vector<8x128xf32>
    %66 = vector.broadcast %7 : vector<1x128xf32> to vector<8x128xf32>
    %67 = arith.addf %65, %66 : vector<8x128xf32>
    %68 = math.tanh %67 : vector<8x128xf32>
    %c0_29 = arith.constant 0 : index
    %c0_30 = arith.constant 0 : index
    %69 = vector.load %arg6[%c0_29, %c0_30] : memref<8x128xf32, #tpu.memory_space<vmem>>, vector<8x128xf32>
    tpu.vector_store %arg6[%c0_29, %c0_30], %68 {strides = array<i32>} : memref<8x128xf32, #tpu.memory_space<vmem>>, vector<8x128xf32>,
    return
  }
  func.func @transform_0(%arg0: i32) -> (i32, i32) {
    %c0_i32 = arith.constant 0 : i32
    %c0_i32_0 = arith.constant 0 : i32
    return %arg0, %c0_i32 : i32, i32
  }
  func.func @transform_1(%arg0: i32) -> (i32, i32) {
    %c0_i32 = arith.constant 0 : i32
    %c0_i32_0 = arith.constant 0 : i32
    %c0_i32_1 = arith.constant 0 : i32
    return %c0_i32, %c0_i32_0 : i32, i32
  }
  func.func @transform_2(%arg0: i32) -> (i32, i32) {
    %c0_i32 = arith.constant 0 : i32
    %c0_i32_0 = arith.constant 0 : i32
    %c0_i32_1 = arith.constant 0 : i32
    return %c0_i32, %c0_i32_0 : i32, i32
  }
  func.func @transform_3(%arg0: i32) -> (i32, i32) {
    %c0_i32 = arith.constant 0 : i32
    %c0_i32_0 = arith.constant 0 : i32
    %c0_i32_1 = arith.constant 0 : i32
    return %c0_i32, %c0_i32_0 : i32, i32
  }
  func.func @transform_4(%arg0: i32) -> (i32, i32) {
    %c0_i32 = arith.constant 0 : i32
    %c0_i32_0 = arith.constant 0 : i32
    %c0_i32_1 = arith.constant 0 : i32
    return %c0_i32, %c0_i32_0 : i32, i32
  }
  func.func @transform_5(%arg0: i32) -> (i32, i32) {
    %c0_i32 = arith.constant 0 : i32
    %c0_i32_0 = arith.constant 0 : i32
    return %arg0, %c0_i32 : i32, i32
  }
}

</mosaic_0001>

<bundles_post_ra>
// kernel: tpu_custom_call.1
= control target key start
LH: loop header
LB: loop body
LE: loop exit
PB: predicated region body
PF: predicated region fallthrough
CT: control target
= control target key end

     0   :  { %10 = vsyncpa [#allocation3], 0  ;;  %s863_s0 = inlined_call_operand.hbm [shape: f32[8,16], index: 0, kind: input, shape index: {}]   ;;  %s864_s1 = inlined_call_operand.hbm [shape: f32[16,128], index: 1, kind: input, shape index: {}]   ;;  %s865_s2 = inlined_call_operand.hbm [shape: f32[128,128], index: 2, kind: input, shape index: {}]   ;;  %s866_s3 = inlined_call_operand.hbm [shape: f32[128,128], index: 3, kind: input, shape index: {}]   ;;  %s867_s4 = inlined_call_operand.vmem [shape: f32[8,128], index: 4, kind: input, shape index: {}]   ;;  %s868_s5 = inlined_call_operand.hbm [shape: f32[8,128], index: 5, kind: output, shape index: {}]  }
   0x1   :  { %11 = vsyncpa [#allocation6], 0 }
   0x2   :  { %12 = vsyncpa [#allocation9], 0 }
   0x3   :  { %13 = vsyncpa [#allocation4], 0  ;;  %s716_s18 = smov [#allocation5]   ;;  %s598_s22 = scalar_lea.hbm %s864_s1, 256 }
   0x4   :  { %s29_s19 = sshll.u32 %s716_s18, 4  ;;  %p599_p0 = scmp.ne.s32.totalorder %s864_s1, %s598_s22  ;;  %s30_s19 = int_to_ptr.vmem [resolvable:$true] %s29_s19 }
   0x5   :  { %p602_p1 = scmp.lt.u32.totalorder %s598_s22, %s864_s1 }
   0x7   :  { %p604_p2 = pnand %p602_p1, %p599_p0 }
   0x9   :  { %607 = shalt.err (!%p604_p2)
}
   0xa   :  { %s608_s27 = scalar_lea.vmem %s30_s19, 256  ;;  %p613_p4 = scmp.lt.s32.totalorder %s30_s19, %s30_s19 }
   0xb   :  { %p609_p3 = scmp.ne.s32.totalorder %s30_s19, %s608_s27  ;;  %p614_p5 = scmp.lt.s32.totalorder %s608_s27, %s608_s27 }
   0xd   :  { %p615_p6 = por %p614_p5, %p613_p4 }
   0xf   :  { %p616_p7 = pnand %p615_p6, %p609_p3 }
  0x11   :  { %619 = shalt.err (!%p616_p7)
}
  0x12   :  { %s717_s28 = smov 128   ;;  %s718_s29 = smov 8  }
  0x13   :  { %35 = dma.hbm_to_vmem [thread:$0]  %s864_s1, 256, %s30_s19, [#allocation6], %s717_s28, %s717_s28, %s718_s29  }
  0x14   :  { %s719_s7 = smov [#allocation2]   ;;  %s720_s9 = smov [#allocation7]  }
  0x15   :  { %s20_s8 = sshll.u32 %s719_s7, 4  ;;  %s41_s10 = sshll.u32 %s720_s9, 4  ;;  %s21_s8 = int_to_ptr.vmem [resolvable:$true] %s20_s8  ;;  %s42_s10 = int_to_ptr.vmem [resolvable:$true] %s41_s10 }
  0x16   :  { %s620_s13 = scalar_lea.hbm %s863_s0, 128 }
  0x17   :  { %p621_p8 = scmp.ne.s32.totalorder %s863_s0, %s620_s13  ;;  %p624_p9 = scmp.lt.u32.totalorder %s620_s13, %s863_s0 }
  0x19   :  { %p626_p10 = pnand %p624_p9, %p621_p8 }
  0x1b   :  { %629 = shalt.err (!%p626_p10)
}
  0x1c   :  { %s630_s1 = scalar_lea.vmem %s21_s8, 128  ;;  %p635_p12 = scmp.lt.s32.totalorder %s21_s8, %s21_s8 }
  0x1d   :  { %p631_p11 = scmp.ne.s32.totalorder %s21_s8, %s630_s1  ;;  %p636_p13 = scmp.lt.s32.totalorder %s630_s1, %s630_s1 }
  0x1f   :  { %p637_p0 = por %p636_p13, %p635_p12 }
  0x21   :  { %p638_p1 = pnand %p637_p0, %p631_p11 }
  0x23   :  { %641 = shalt.err (!%p638_p1)
}
  0x24   :  { %23 = dma.hbm_to_vmem [thread:$0]  %s863_s0, 128, %s21_s8, [#allocation3]  }
  0x25   :  { %s642_s22 = scalar_lea.hbm %s865_s2, 2048 }
  0x26   :  { %p643_p2 = scmp.ne.s32.totalorder %s865_s2, %s642_s22  ;;  %p646_p3 = scmp.lt.u32.totalorder %s642_s22, %s865_s2 }
  0x28   :  { %p648_p4 = pnand %p646_p3, %p643_p2 }
  0x2a   :  { %651 = shalt.err (!%p648_p4)
}
  0x2b   :  { %s652_s27 = scalar_lea.vmem %s42_s10, 2048  ;;  %p657_p6 = scmp.lt.s32.totalorder %s42_s10, %s42_s10 }
  0x2c   :  { %p653_p5 = scmp.ne.s32.totalorder %s42_s10, %s652_s27  ;;  %p658_p7 = scmp.lt.s32.totalorder %s652_s27, %s652_s27 }
  0x2e   :  { %p659_p8 = por %p658_p7, %p657_p6 }
  0x30   :  { %p660_p9 = pnand %p659_p8, %p653_p5 }
  0x32   :  { %663 = shalt.err (!%p660_p9)
}
  0x33   :  { %47 = dma.hbm_to_vmem [thread:$0]  %s865_s2, 2048, %s42_s10, [#allocation6], %s717_s28, %s717_s28, %s718_s29  }
  0x34   :  { %s721_s6 = smov [#allocation8]   ;;  %s664_s11 = scalar_lea.hbm %s866_s3, 2048 }
  0x35   :  { %s53_s7 = sshll.u32 %s721_s6, 4  ;;  %p665_p10 = scmp.ne.s32.totalorder %s866_s3, %s664_s11  ;;  %s54_s7 = int_to_ptr.vmem [resolvable:$true] %s53_s7 }
  0x36   :  { %p668_p11 = scmp.lt.u32.totalorder %s664_s11, %s866_s3 }
  0x38   :  { %p670_p12 = pnand %p668_p11, %p665_p10 }
  0x3a   :  { %673 = shalt.err (!%p670_p12)
}
  0x3b   :  { %s674_s16 = scalar_lea.vmem %s54_s7, 2048  ;;  %p679_p0 = scmp.lt.s32.totalorder %s54_s7, %s54_s7 }
  0x3c   :  { %p675_p13 = scmp.ne.s32.totalorder %s54_s7, %s674_s16  ;;  %p680_p1 = scmp.lt.s32.totalorder %s674_s16, %s674_s16 }
  0x3e   :  { %p681_p2 = por %p680_p1, %p679_p0 }
  0x40   :  { %p682_p3 = pnand %p681_p2, %p675_p13 }
  0x42   :  { %685 = shalt.err (!%p682_p3)
}
  0x43   :  { %59 = dma.hbm_to_vmem [thread:$0]  %s866_s3, 2048, %s54_s7, [#allocation9], %s717_s28, %s717_s28, %s718_s29  }
  0x44   :  { %708 = dma.done.wait [#allocation3], 128  }
  0x45   :  { %709 = vsyncadd [#allocation3], 4294967168 }
  0x46   :  { %710 = dma.done.wait [#allocation6], 2304  }
  0x47   :  { %711 = vsyncadd [#allocation6], 4294964992 }
  0x48   :  { %712 = dma.done.wait [#allocation9], 2048  }
  0x49   :  { %713 = vsyncadd [#allocation9], 4294965248  ;;  %v722_v0 = vmov 0.0|0.0   ;;  %vm723_vm0 = vmmov 0   ;;  %v724_v1 = vmov 0.0   ;;  %v82_v2 = vld [vmem:[#allocation5] sm:$0xff] }
  0x4a   :  { %531 = vmatprep.subr.bf16.mxu0 %v722_v0  ;;  %458 = vmatprep.mubr.msk.f32.mxu0 %vm723_vm0, %v724_v1  ;;  %v83_v3 = vld [vmem:[#allocation5 + $0x8] sm:$0xff]  ;;  %v74_v5 = vld [vmem:[#allocation2] sm:$0xff]  ;;  %vm88_vm1 = vcmask 130048   ;;  %v186_v6 = vld [vmem:[#allocation7] sm:$0xff]  ;;  %s725_s27 = smov [#allocation10]  }
  0x4b   :  { %534 = vmatprep.subr.bf16.mxu1 %v722_v0  ;;  %493 = vmatprep.mubr.msk.f32.mxu1 %vm723_vm0, %v724_v1  ;;  %v532_v4 = vpack.c.bf16 %v83_v3, %v82_v2  ;;  %v187_v7 = vld [vmem:[#allocation7 + $0x8] sm:$0xff]  ;;  %v188_v14 = vld [vmem:[#allocation7 + $0x10] sm:$0xff]  ;;  %v189_v15 = vld [vmem:[#allocation7 + $0x18] sm:$0xff]  ;;  %s398_s0 = sshll.u32 %s725_s27, 4  ;;  %s399_s0 = int_to_ptr.vmem [resolvable:$true] %s398_s0 }
  0x4c   :  { %v535_v8 = vpack.c.bf16 %v187_v7, %v186_v6  ;;  %v409_v9 = vld [vmem:[%s867_s4] ss:$0 sm:$0xff]  ;;  %v538_v16 = vpack.c.bf16 %v189_v15, %v188_v14  ;;  %v190_v17 = vld [vmem:[#allocation7 + $0x20] sm:$0xff]  ;;  %v192_v20 = vld [vmem:[#allocation7 + $0x30] sm:$0xff]  ;;  %s686_s30 = scalar_lea.vmem %s399_s0, 128  ;;  %p691_p5 = scmp.lt.s32.totalorder %s399_s0, %s399_s0 }
  0x4d   :  { %533 = vmatpush3.bf16.msra.mxu0 %v532_v4  ;;  %v191_v18 = vld [vmem:[#allocation7 + $0x28] sm:$0xff]  ;;  %v193_v21 = vld [vmem:[#allocation7 + $0x38] sm:$0xff]  ;;  %v194_v23 = vld [vmem:[#allocation7 + $0x40] sm:$0xff]  ;;  %p687_p4 = scmp.ne.s32.totalorder %s399_s0, %s686_s30  ;;  %p692_p6 = scmp.lt.s32.totalorder %s686_s30, %s686_s30 }
  0x4e   :  { %558 = vmatprep.subr.bf16.mxu0 %v722_v0  ;;  %536 = vmatpush3.bf16.msra.mxu1 %v535_v8  ;;  %v541_v19 = vpack.c.bf16 %v191_v18, %v190_v17  ;;  %v544_v22 = vpack.c.bf16 %v193_v21, %v192_v20  ;;  %v195_v24 = vld [vmem:[#allocation7 + $0x48] sm:$0xff]  ;;  %v196_v26 = vld [vmem:[#allocation7 + $0x50] sm:$0xff]  ;;  %v197_v27 = vld [vmem:[#allocation7 + $0x58] sm:$0xff] }
  0x4f   :  { %537 = vmatprep.subr.bf16.mxu1 %v722_v0  ;;  %v547_v25 = vpack.c.bf16 %v195_v24, %v194_v23  ;;  %v550_v28 = vpack.c.bf16 %v197_v27, %v196_v26  ;;  %v198_v29 = vld [vmem:[#allocation7 + $0x60] sm:$0xff]  ;;  %v199_v30 = vld [vmem:[#allocation7 + $0x68] sm:$0xff]  ;;  %v200_v32 = vld [vmem:[#allocation7 + $0x70] sm:$0xff]  ;;  %p693_p7 = por %p692_p6, %p691_p5 }
  0x50   :  { %459 = vmatmul.mubr.msk.f32.vlgmr.msra.gmra.mrb[0].mxu0 %vm88_vm1, %v74_v5  ;;  %v553_v31 = vpack.c.bf16 %v199_v30, %v198_v29  ;;  %v201_v33 = vld [vmem:[#allocation7 + $0x78] sm:$0xff]  ;;  %v411_v44 = vld [vmem:[%s867_s4 + $0x1] ss:$0 sm:$0xff]  ;;  %v412_v46 = vld [vmem:[%s867_s4 + $0x2] ss:$0 sm:$0xff] }
  0x51   :  { %528 = vmatprep.mubr.msk.f32.mxu0 %vm723_vm0, %v724_v1  ;;  %v556_v34 = vpack.c.bf16 %v201_v33, %v200_v32  ;;  %v300_v50 = vld [vmem:[#allocation8] sm:$0xff]  ;;  %v301_v51 = vld [vmem:[#allocation8 + $0x8] sm:$0xff]  ;;  %v302_v58 = vld [vmem:[#allocation8 + $0x10] sm:$0xff]  ;;  %p694_p8 = pnand %p693_p7, %p687_p4 }
  0x52   :  { %539 = vmatpush3.bf16.msra.mxu1 %v538_v16  ;;  %v559_v52 = vpack.c.bf16 %v301_v51, %v300_v50  ;;  %v413_v53 = vld [vmem:[%s867_s4 + $0x3] ss:$0 sm:$0xff]  ;;  %v303_v59 = vld [vmem:[#allocation8 + $0x18] sm:$0xff]  ;;  %v304_v61 = vld [vmem:[#allocation8 + $0x20] sm:$0xff] }
  0x53   :  { %540 = vmatprep.subr.bf16.mxu1 %v722_v0  ;;  %v562_v60 = vpack.c.bf16 %v303_v59, %v302_v58  ;;  %v305_v62 = vld [vmem:[#allocation8 + $0x28] sm:$0xff]  ;;  %v306_v1 = vld [vmem:[#allocation8 + $0x30] sm:$0xff]  ;;  %v307_v2 = vld [vmem:[#allocation8 + $0x38] sm:$0xff] }
  0x54   :  { %560 = vmatpush3.bf16.msra.mxu0 %v559_v52  ;;  %v565_v63 = vpack.c.bf16 %v305_v62, %v304_v61  ;;  %v568_v3 = vpack.c.bf16 %v307_v2, %v306_v1  ;;  %v308_v4 = vld [vmem:[#allocation8 + $0x40] sm:$0xff]  ;;  %v309_v5 = vld [vmem:[#allocation8 + $0x48] sm:$0xff]  ;;  %v310_v7 = vld [vmem:[#allocation8 + $0x50] sm:$0xff] }
  0x55   :  { %561 = vmatprep.subr.bf16.mxu0 %v722_v0  ;;  %v571_v6 = vpack.c.bf16 %v309_v5, %v308_v4  ;;  %v311_v8 = vld [vmem:[#allocation8 + $0x58] sm:$0xff]  ;;  %v416_v30 = vld [vmem:[%s867_s4 + $0x6] ss:$0 sm:$0xff] }
  0x56   :  { %542 = vmatpush3.bf16.msra.mxu1 %v541_v19  ;;  %v315_v14 = vld [vmem:[#allocation8 + $0x78] sm:$0xff] }
  0x57   :  { %543 = vmatprep.subr.bf16.mxu1 %v722_v0 }
  0x58   :  { %563 = vmatpush3.bf16.msra.mxu0 %v562_v60 }
  0x59   :  { %564 = vmatprep.subr.bf16.mxu0 %v722_v0 }
  0x5a   :  { %545 = vmatpush3.bf16.msra.mxu1 %v544_v22 }
  0x5b   :  { %546 = vmatprep.subr.bf16.mxu1 %v722_v0 }
  0x5c   :  { %566 = vmatpush3.bf16.msra.mxu0 %v565_v63 }
  0x5d   :  { %567 = vmatprep.subr.bf16.mxu0 %v722_v0 }
  0x5e   :  { %548 = vmatpush3.bf16.msra.mxu1 %v547_v25  ;;  %v414_v25 = vld [vmem:[%s867_s4 + $0x4] ss:$0 sm:$0xff] }
  0x5f   :  { %549 = vmatprep.subr.bf16.mxu1 %v722_v0 }
  0x60   :  { %569 = vmatpush3.bf16.msra.mxu0 %v568_v3 }
  0x61   :  { %570 = vmatprep.subr.bf16.mxu0 %v722_v0 }
  0x62   :  { %551 = vmatpush3.bf16.msra.mxu1 %v550_v28 }
  0x63   :  { %552 = vmatprep.subr.bf16.mxu1 %v722_v0 }
  0x64   :  { %572 = vmatpush3.bf16.msra.mxu0 %v571_v6 }
  0x65   :  { %573 = vmatprep.subr.bf16.mxu0 %v722_v0 }
  0x66   :  { %554 = vmatpush3.bf16.msra.mxu1 %v553_v31 }
  0x67   :  { %555 = vmatprep.subr.bf16.mxu1 %v722_v0 }
  0x6a   :  { %557 = vmatpush3.bf16.msra.mxu1 %v556_v34 }
 0x123   :  { %v158_v10 = vpop.f32.mrb[0].mxu0 }
 0x124   :  { %v159_v11 = vadd.f32 %v409_v9, %v158_v10  ;;  %v460_v12 = vpop.f32.mrb[1].mxu0  ;;  %v574_v9 = vpack.c.bf16 %v311_v8, %v310_v7  ;;  %v312_v10 = vld [vmem:[#allocation8 + $0x60] sm:$0xff] }
 0x126   :  { %162 = vadd.xlane.f32.xlu0 %v159_v11  ;;  %v164_v13 = vmul.f32 %v159_v11, %v159_v11  ;;  %575 = vmatpush3.bf16.msra.mxu0 %v574_v9 }
 0x127   :  { %576 = vmatprep.subr.bf16.mxu0 %v722_v0 }
 0x12a   :  { %165 = vadd.xlane.f32.xlu0 %v164_v13  ;;  %v314_v13 = vld [vmem:[#allocation8 + $0x70] sm:$0xff] }
 0x12b   :  { %v580_v15 = vpack.c.bf16 %v315_v14, %v314_v13 }
 0x1b3   :  { %v163_v35 = vpop.xlane.xlu0 %162 }
 0x1b4   :  { %v167_v36 = vmul.f32 0.03125, %v163_v35 }
 0x1b6   :  { %v169_v38 = vmul.f32 %v167_v36, %v167_v36  ;;  %v171_v42 = vsub.f32 %v159_v11, %v167_v36  ;;  %v313_v11 = vld [vmem:[#allocation8 + $0x68] sm:$0xff] }
 0x1b7   :  { %v166_v37 = vpop.xlane.xlu0 %165  ;;  %v577_v12 = vpack.c.bf16 %v313_v11, %v312_v10 }
 0x1b8   :  { %v168_v39 = vmul.f32 0.03125, %v166_v37 }
 0x1b9   :  { %578 = vmatpush3.bf16.msra.mxu0 %v577_v12 }
 0x1ba   :  { %v170_v40 = vsub.f32 %v168_v39, %v169_v38  ;;  %579 = vmatprep.subr.bf16.mxu0 %v722_v0  ;;  %v415_v0 = vld [vmem:[%s867_s4 + $0x5] ss:$0 sm:$0xff] }
 0x1bc   :  { %v172_v41 = vadd.f32 1e-05, %v170_v40 }
 0x1bd   :  { %581 = vmatpush3.bf16.msra.mxu0 %v580_v15 }
 0x1be   :  { %592 = vrsqrt.f32 %v172_v41 }
 0x1c8   :  { %v593_v43 = vpop.eup %592 }
 0x1c9   :  { %v174_v45 = vmul.f32 %v593_v43, %v171_v42 }
 0x1cb   :  { %v179_v47 = vmul.f32 %v411_v44, %v174_v45 }
 0x1cd   :  { %v184_v48 = vadd.f32 %v412_v46, %v179_v47 }
 0x1cf   :  { %v185_v49 = vmax.f32 %v184_v48, 0.0 }
 0x1d1   :  { %494 = vmatmul.mubr.f32.vlgmr.msra.gmra.mrb[0].mxu1 %v185_v49 }
 0x2a4   :  { %v272_v54 = vpop.f32.mrb[0].mxu1 }
 0x2a5   :  { %v273_v55 = vadd.f32 %v413_v53, %v272_v54  ;;  %v495_v56 = vpop.f32.mrb[1].mxu1 }
 0x2a7   :  { %276 = vadd.xlane.f32.xlu1 %v273_v55  ;;  %v278_v57 = vmul.f32 %v273_v55, %v273_v55 }
 0x2ab   :  { %279 = vadd.xlane.f32.xlu1 %v278_v57 }
 0x334   :  { %v277_v16 = vpop.xlane.xlu1 %276 }
 0x335   :  { %v281_v17 = vmul.f32 0.03125, %v277_v16 }
 0x337   :  { %v283_v19 = vmul.f32 %v281_v17, %v281_v17  ;;  %v285_v23 = vsub.f32 %v273_v55, %v281_v17 }
 0x338   :  { %v280_v18 = vpop.xlane.xlu1 %279 }
 0x339   :  { %v282_v20 = vmul.f32 0.03125, %v280_v18 }
 0x33b   :  { %v284_v21 = vsub.f32 %v282_v20, %v283_v19 }
 0x33d   :  { %v286_v22 = vadd.f32 1e-05, %v284_v21 }
 0x33f   :  { %594 = vrsqrt.f32 %v286_v22 }
 0x349   :  { %v595_v24 = vpop.eup %594 }
 0x34a   :  { %v288_v26 = vmul.f32 %v595_v24, %v285_v23 }
 0x34c   :  { %v293_v27 = vmul.f32 %v414_v25, %v288_v26 }
 0x34e   :  { %v298_v28 = vadd.f32 %v415_v0, %v293_v27 }
 0x350   :  { %v299_v29 = vmax.f32 %v298_v28, 0.0 }
 0x352   :  { %529 = vmatmul.mubr.f32.vlgmr.msra.gmra.mrb[2].mxu0 %v299_v29 }
 0x425   :  { %v386_v31 = vpop.f32.mrb[2].mxu0 }
 0x426   :  { %v387_v32 = vadd.f32 %v416_v30, %v386_v31  ;;  %v530_v33 = vpop.f32.mrb[3].mxu0 }
 0x428   :  { %596 = vtanh.f32 %v387_v32 }
 0x432   :  { %v597_v34 = vpop.eup %596 }
 0x433   :  { %391 = vst [vmem:[#allocation10] sm:$0xff] %v597_v34 }
 0x434   :  { %697 = shalt.err (!%p694_p8)
}
 0x435   :  { %s698_s4 = scalar_lea.hbm %s868_s5, 128 }
 0x436   :  { %p699_p9 = scmp.ne.s32.totalorder %s868_s5, %s698_s4  ;;  %p702_p10 = scmp.lt.u32.totalorder %s698_s4, %s868_s5 }
 0x438   :  { %p704_p11 = pnand %p702_p10, %p699_p9 }
 0x43a   :  { %707 = shalt.err (!%p704_p11)
}
 0x43b   :  { %401 = dma.vmem_to_hbm [thread:$0]  %s399_s0, 128, %s868_s5, [#allocation4]  }
 0x43c   :  { %714 = dma.done.wait [#allocation4], 128  }
 0x43d   :  { %715 = vsyncadd [#allocation4], 4294967168 }
 0x43e   :  { %405 = vsyncpa [#allocation3], 1 }
 0x43f   :  { %406 = vsyncpa [#allocation6], 1 }
 0x440   :  { %407 = vsyncpa [#allocation9], 1 }
 0x441   :  { %408 = vsyncpa [#allocation4], 1 }

</bundles_post_ra>
